<compile_context>
chip_gen: v7x
topology: tpu7x:2x2x1
jax: 0.10.0
libtpu: 0.0.40
codegen_flags: <defaults>
</compile_context>

<pallas_src>
from functools import partial

import jax
import jax.numpy as jnp
import numpy as np
from jax.experimental import pallas as pl
from jax.experimental.pallas import tpu as pltpu


def _round_up(x, m):
    return ((x + m - 1) // m) * m


# --------------------------------------------------------------------------- #
# Kernel
# --------------------------------------------------------------------------- #
def icm_kernel(sx_ref, action_ref,
               w1_ref, w2_ref, w3_ref,
               w_es_ref, wi1_n_ref, wi2_ref,
               wf1_a_ref, wf2_ref, bias_ref,
               out_ref):
    bt = sx_ref.shape[0] // 2          # batch tile (multiple of 8)
    hp = w2_ref.shape[0]               # hidden_dim padded to a multiple of 128
    ap = wi2_ref.shape[1]              # action_dim padded to a multiple of 128

    def mm(x, w_ref):
        # bf16 MXU operands, f32 accumulation.
        return jnp.dot(x.astype(w_ref.dtype), w_ref[...],
                       preferred_element_type=jnp.float32)

    # ---- stacked feature pass: [state_tile; next_state_tile] --------------- #
    x = sx_ref[...]                                            # (2*bt, S)
    h1 = jnp.maximum(mm(x, w1_ref) + bias_ref[0:1, :hp], 0.0)
    h2 = jnp.maximum(mm(h1, w2_ref) + bias_ref[1:2, :hp], 0.0)
    enc = mm(h2, w3_ref) + bias_ref[2:3, :hp]
    enc_s = enc[:bt]                   # encode(state)
    enc_ns = enc[bt:]                  # encode(next_state)

    # ---- merged enc_s matmul: [wi1_s | wf1_s] -> one (bt,Hp)x(Hp,2Hp) ------ #
    es2 = mm(enc_s, w_es_ref)                                  # (bt, 2*Hp)

    # ---- inverse net: cat([enc_s, enc_ns], 1) in split-weight form --------- #
    h_inv = jnp.maximum(es2[:, :hp] + mm(enc_ns, wi1_n_ref)
                        + bias_ref[3:4, :hp], 0.0)
    pred_action = mm(h_inv, wi2_ref) + bias_ref[4:5, :ap]

    # ---- forward net: cat([enc_s, action], 1) in split-weight form --------- #
    h_fwd = jnp.maximum(es2[:, hp:] + mm(action_ref[...], wf1_a_ref)
                        + bias_ref[5:6, :hp], 0.0)
    pred_next = mm(h_fwd, wf2_ref) + bias_ref[6:7, :hp]

    # ---- lane-aligned packed writeback (offsets 0, Hp, 2*Hp) ---------------- #
    # All three stores are unmasked full-lane stores; no zero epilogue needed.
    out_ref[:, 0:hp] = pred_next
    out_ref[:, hp:2 * hp] = enc_ns
    out_ref[:, 2 * hp:2 * hp + ap] = pred_action


# --------------------------------------------------------------------------- #
# Parameter construction / one-time preparation (hoisted off the call path)
# --------------------------------------------------------------------------- #
def _linear_init(key, fan_in, fan_out):
    """PyTorch-style init: U(-1/sqrt(fan_in), 1/sqrt(fan_in)).
    Weight returned as [in, out] (transposed vs torch's [out, in])."""
    kw, kb = jax.random.split(key)
    bound = 1.0 / np.sqrt(fan_in)
    w = jax.random.uniform(kw, (fan_in, fan_out), jnp.float32, -bound, bound)
    b = jax.random.uniform(kb, (1, fan_out), jnp.float32, -bound, bound)
    return w, b


def init_icm_params(key, state_dim, action_dim, hidden_dim):
    keys = jax.random.split(key, 7)
    p = {}
    # feature net
    p["w1"], p["b1"] = _linear_init(keys[0], state_dim, hidden_dim)
    p["w2"], p["b2"] = _linear_init(keys[1], hidden_dim, hidden_dim)
    p["w3"], p["b3"] = _linear_init(keys[2], hidden_dim, hidden_dim)
    # inverse net
    p["wi1"], p["bi1"] = _linear_init(keys[3], 2 * hidden_dim, hidden_dim)
    p["wi2"], p["bi2"] = _linear_init(keys[4], hidden_dim, action_dim)
    # forward net (input = cat([encoded_state(H), action(A)], 1))
    p["wf1"], p["bf1"] = _linear_init(keys[5], action_dim + hidden_dim, hidden_dim)
    p["wf2"], p["bf2"] = _linear_init(keys[6], hidden_dim, hidden_dim)
    return p


def _pad2(w, rows, cols):
    r, c = w.shape
    return jnp.pad(w, ((0, rows - r), (0, cols - c)))


def prepare_icm_params(params, compute_dtype=jnp.bfloat16):
    """One-time prep: split/merge the concat-weights, zero-pad H and A to
    multiples of 128 (lane-dense matmuls and 128-aligned output segments),
    cast MXU operands to the compute dtype, and pack all biases into one
    (8, 128k) f32 array."""
    S, H = params["w1"].shape
    A = params["wi2"].shape[1]
    Hp = _round_up(H, 128)
    Ap = _round_up(A, 128)
    Wmax = max(Hp, Ap)
    cd = compute_dtype

    wi1_s, wi1_n = params["wi1"][:H], params["wi1"][H:]
    wf1_s, wf1_a = params["wf1"][:H], params["wf1"][H:]

    biases = jnp.zeros((8, Wmax), jnp.float32)

    def put(bm, row, b):
        return bm.at[row, :b.shape[-1]].set(b.reshape(-1))

    biases = put(biases, 0, params["b1"])
    biases = put(biases, 1, params["b2"])
    biases = put(biases, 2, params["b3"])
    biases = put(biases, 3, params["bi1"])
    biases = put(biases, 4, params["bi2"])
    biases = put(biases, 5, params["bf1"])
    biases = put(biases, 6, params["bf2"])

    return {
        "w1": _pad2(params["w1"], S, Hp).astype(cd),
        "w2": _pad2(params["w2"], Hp, Hp).astype(cd),
        "w3": _pad2(params["w3"], Hp, Hp).astype(cd),
        # merged enc_s weight: [wi1_s | wf1_s] -> (Hp, 2*Hp)
        "w_es": jnp.concatenate(
            [_pad2(wi1_s, Hp, Hp), _pad2(wf1_s, Hp, Hp)], axis=1).astype(cd),
        "wi1_n": _pad2(wi1_n, Hp, Hp).astype(cd),
        "wi2": _pad2(params["wi2"], Hp, Ap).astype(cd),
        "wf1_a": _pad2(wf1_a, A, Hp).astype(cd),   # in-dim stays A (matches action)
        "wf2": _pad2(params["wf2"], Hp, Hp).astype(cd),
        "biases": biases,
    }


# --------------------------------------------------------------------------- #
# Forward wrapper
# --------------------------------------------------------------------------- #
@partial(jax.jit, static_argnames=("hidden_dim", "b_tile"))
def icm_forward(prep, state, next_state, action, *, hidden_dim, b_tile=256):
    """Pallas implementation of ICM.forward(state, next_state, action)."""
    B, S = state.shape
    H = hidden_dim
    Hp = prep["w2"].shape[0]
    Ap = prep["wi2"].shape[1]

    next_state = next_state.astype(state.dtype)
    # explicit reshape (robust replacement for torch's action.squeeze())
    action = action.reshape(B, -1)
    A = action.shape[1]
    if A != prep["wf1_a"].shape[0]:
        raise ValueError("action must be a dense/one-hot (B, action_dim) array")

    # --- batch tiling: sublane-aligned; keep >= 2 grid steps when B >= 16 so
    #     ("parallel",) can shard across both v7x TensorCores. ----------------
    B8 = _round_up(B, 8)
    cap = _round_up(pl.cdiv(B8, 2), 8) if B8 >= 16 else B8
    B_TILE = max(8, min(b_tile, cap))
    Bp = _round_up(B8, B_TILE)
    if Bp > B:
        pad = ((0, Bp - B), (0, 0))
        state = jnp.pad(state, pad)
        next_state = jnp.pad(next_state, pad)
        action = jnp.pad(action, pad)
    n_steps = Bp // B_TILE
    grid = (n_steps,)

    # Pre-stack state/next_state so tile i of the stacked array is exactly
    # [state_tile_i ; next_state_tile_i] -> one input stream, no in-kernel
    # concatenate/reshape.
    sx = jnp.concatenate(
        [state.reshape(n_steps, B_TILE, S),
         next_state.reshape(n_steps, B_TILE, S)],
        axis=1).reshape(2 * Bp, S)

    OUT = 2 * Hp + Ap                  # packed, 128-aligned output width

    weights = (prep["w1"], prep["w2"], prep["w3"], prep["w_es"],
               prep["wi1_n"], prep["wi2"], prep["wf1_a"], prep["wf2"],
               prep["biases"])

    full_spec = lambda w: pl.BlockSpec(w.shape, lambda i: (0, 0))

    # --- explicit VMEM budget (double-buffered I/O + resident weights +
    #     intermediate headroom), capped at 64 MiB so it also fits v7x. -------
    in_bytes = 2 * (2 * B_TILE * S * state.dtype.itemsize
                    + B_TILE * A * action.dtype.itemsize)
    out_bytes = 2 * B_TILE * OUT * 4
    w_bytes = sum(int(np.prod(w.shape)) * w.dtype.itemsize for w in weights)
    interm_bytes = 10 * B_TILE * max(OUT, S) * 4
    vmem_limit = int(min(max(2 * (in_bytes + out_bytes + 2 * w_bytes + interm_bytes),
                             32 * 1024 * 1024),
                         64 * 1024 * 1024))

    # advisory cost model for XLA scheduling around the custom call
    macs_per_row = (2 * (S * Hp + 2 * Hp * Hp)     # stacked feature pass
                    + 2 * Hp * Hp                  # merged enc_s matmul
                    + Hp * Hp + Hp * Ap            # inverse net (enc_ns, wi2)
                    + A * Hp + Hp * Hp)            # forward net (action, wf2)
    io_bytes = (Bp * (2 * S + A) * state.dtype.itemsize + Bp * OUT * 4 + w_bytes)
    cost = pl.CostEstimate(flops=int(2 * macs_per_row * Bp), transcendentals=0,
                           bytes_accessed=int(io_bytes))

    packed = pl.pallas_call(
        icm_kernel,
        out_shape=jax.ShapeDtypeStruct((Bp, OUT), jnp.float32),
        grid=grid,
        in_specs=[pl.BlockSpec((2 * B_TILE, S), lambda i: (i, 0)),
                  pl.BlockSpec((B_TILE, A), lambda i: (i, 0))]
                 + [full_spec(w) for w in weights],
        out_specs=pl.BlockSpec((B_TILE, OUT), lambda i: (i, 0)),
        compiler_params=pltpu.CompilerParams(
            dimension_semantics=("parallel",),
            vmem_limit_bytes=vmem_limit),
        cost_estimate=cost,
    )(sx, action, *weights)

    pred_next = packed[:B, 0:H]
    real_next = packed[:B, Hp:Hp + H]
    pred_action = packed[:B, 2 * Hp:2 * Hp + A]
    return pred_next, real_next, pred_action


# --------------------------------------------------------------------------- #
# Pure-JAX reference (original torch semantics; optional bf16-matched mode)
# --------------------------------------------------------------------------- #
def icm_forward_ref(params, state, next_state, action,
                    compute_dtype=jnp.float32):
    cd = compute_dtype
    B = state.shape[0]
    A = params["bi2"].shape[-1]
    act = action.astype(jnp.float32).reshape(B, A)

    def lin(x, w, b):
        return jnp.dot(x.astype(cd), w.astype(cd),
                       preferred_element_type=jnp.float32) + b

    def feature(x):
        h = jnp.maximum(lin(x, params["w1"], params["b1"]), 0.0)
        h = jnp.maximum(lin(h, params["w2"], params["b2"]), 0.0)
        return lin(h, params["w3"], params["b3"])

    enc_s = feature(state.astype(jnp.float32))
    enc_ns = feature(next_state.astype(jnp.float32))
    inv_in = jnp.concatenate([enc_s, enc_ns], axis=1)
    h_inv = jnp.maximum(lin(inv_in, params["wi1"], params["bi1"]), 0.0)
    pred_action = lin(h_inv, params["wi2"], params["bi2"])
    fwd_in = jnp.concatenate([enc_s, act], axis=1)
    h_fwd = jnp.maximum(lin(fwd_in, params["wf1"], params["bf1"]), 0.0)
    pred_next = lin(h_fwd, params["wf2"], params["bf2"])
    return pred_next, enc_ns, pred_action


# --------------------------------------------------------------------------- #
# Demo / correctness check
# --------------------------------------------------------------------------- #
if __name__ == "__main__":
    key = jax.random.PRNGKey(0)
    B, STATE_DIM, ACTION_DIM, HIDDEN_DIM = 16, 16, 4, 32

    k_param, k_s, k_ns, k_a = jax.random.split(key, 4)
    params = init_icm_params(k_param, STATE_DIM, ACTION_DIM, HIDDEN_DIM)
    prep = prepare_icm_params(params, compute_dtype=jnp.bfloat16)

    state = jax.random.normal(k_s, (B, STATE_DIM), jnp.float32)
    next_state = jax.random.normal(k_ns, (B, STATE_DIM), jnp.float32)
    action_idx = jax.random.randint(k_a, (B,), 0, ACTION_DIM)
    action = jax.nn.one_hot(action_idx, ACTION_DIM, dtype=jnp.float32)
    # NOTE: like the torch module (action.squeeze() then cat), a dense/one-hot
    # (B, action_dim) float action is assumed.

    # small b_tile so the batch grid (and its pipelining path) is exercised
    pred_next, real_next, pred_action = icm_forward(
        prep, state, next_state, action, hidden_dim=HIDDEN_DIM, b_tile=8)
    jax.block_until_ready((pred_next, real_next, pred_action))

    # strict check vs a precision-matched reference (bf16 MXU operands, f32 acc)
    pn_m, rn_m, pa_m = icm_forward_ref(params, state, next_state, action,
                                       compute_dtype=jnp.bfloat16)
    np.testing.assert_allclose(np.asarray(pred_next), np.asarray(pn_m),
                               atol=2e-3, rtol=2e-3)
    np.testing.assert_allclose(np.asarray(real_next), np.asarray(rn_m),
                               atol=2e-3, rtol=2e-3)
    np.testing.assert_allclose(np.asarray(pred_action), np.asarray(pa_m),
                               atol=2e-3, rtol=2e-3)

    # loose check vs the full-f32 (PyTorch-equivalent) reference
    pn_f, rn_f, pa_f = icm_forward_ref(params, state, next_state, action,
                                       compute_dtype=jnp.float32)
    np.testing.assert_allclose(np.asarray(pred_next), np.asarray(pn_f),
                               atol=5e-2, rtol=5e-2)
    np.testing.assert_allclose(np.asarray(real_next), np.asarray(rn_f),
                               atol=5e-2, rtol=5e-2)
    np.testing.assert_allclose(np.asarray(pred_action), np.asarray(pa_f),
                               atol=5e-2, rtol=5e-2)

    print("KERNEL_OK")
</pallas_src>

<mosaic_0001>
module attributes {stable_mosaic.version = 11 : i64} {
  func.func @icm_kernel(%arg0: i32, %arg1: memref<16x16xf32, #tpu.memory_space<vmem>>, %arg2: memref<8x4xf32, #tpu.memory_space<vmem>>, %arg3: memref<16x128xbf16, #tpu.memory_space<vmem>>, %arg4: memref<128x128xbf16, #tpu.memory_space<vmem>>, %arg5: memref<128x128xbf16, #tpu.memory_space<vmem>>, %arg6: memref<128x256xbf16, #tpu.memory_space<vmem>>, %arg7: memref<128x128xbf16, #tpu.memory_space<vmem>>, %arg8: memref<128x128xbf16, #tpu.memory_space<vmem>>, %arg9: memref<4x128xbf16, #tpu.memory_space<vmem>>, %arg10: memref<128x128xbf16, #tpu.memory_space<vmem>>, %arg11: memref<8x128xf32, #tpu.memory_space<vmem>>, %arg12: memref<8x384xf32, #tpu.memory_space<vmem>>) attributes {dimension_semantics = [#tpu.dimension_semantics<parallel>], iteration_bounds = array<i64: 2>, scalar_prefetch = 0 : i64, scratch_operands = 0 : i64, tpu.core_type = #tpu.core_type<tc>, window_params = [{transform_indices = @transform_0, window_bounds = array<i64: 16, 16>}, {transform_indices = @transform_1, window_bounds = array<i64: 8, 4>}, {pipeline_mode = #tpu.pipeline_mode<synchronous>, transform_indices = @transform_2, window_bounds = array<i64: 16, 128>}, {pipeline_mode = #tpu.pipeline_mode<synchronous>, transform_indices = @transform_3, window_bounds = array<i64: 128, 128>}, {pipeline_mode = #tpu.pipeline_mode<synchronous>, transform_indices = @transform_4, window_bounds = array<i64: 128, 128>}, {pipeline_mode = #tpu.pipeline_mode<synchronous>, transform_indices = @transform_5, window_bounds = array<i64: 128, 256>}, {pipeline_mode = #tpu.pipeline_mode<synchronous>, transform_indices = @transform_6, window_bounds = array<i64: 128, 128>}, {pipeline_mode = #tpu.pipeline_mode<synchronous>, transform_indices = @transform_7, window_bounds = array<i64: 128, 128>}, {pipeline_mode = #tpu.pipeline_mode<synchronous>, transform_indices = @transform_8, window_bounds = array<i64: 4, 128>}, {pipeline_mode = #tpu.pipeline_mode<synchronous>, transform_indices = @transform_9, window_bounds = array<i64: 128, 128>}, {pipeline_mode = #tpu.pipeline_mode<synchronous>, transform_indices = @transform_10, window_bounds = array<i64: 8, 128>}, {transform_indices = @transform_11, window_bounds = array<i64: 8, 384>}]} {
    %c0 = arith.constant 0 : index
    %c0_0 = arith.constant 0 : index
    %0 = vector.load %arg1[%c0, %c0_0] : memref<16x16xf32, #tpu.memory_space<vmem>>, vector<16x16xf32>
    %1 = arith.truncf %0 : vector<16x16xf32> to vector<16x16xbf16>
    %c0_1 = arith.constant 0 : index
    %c0_2 = arith.constant 0 : index
    %2 = vector.load %arg3[%c0_1, %c0_2] : memref<16x128xbf16, #tpu.memory_space<vmem>>, vector<16x128xbf16>
    %cst = arith.constant dense<0.000000e+00> : vector<16x128xf32>
    %3 = tpu.matmul %1, %2, %cst {dimension_numbers = #tpu.dot_dimension_numbers<[1], [0], [0], [1], [0, 0, 1, 1], [], []>} : vector<16x16xbf16>, vector<16x128xbf16>, vector<16x128xf32> -> vector<16x128xf32>
    %c0_3 = arith.constant 0 : index
    %c0_4 = arith.constant 0 : index
    %4 = vector.load %arg11[%c0_3, %c0_4] : memref<8x128xf32, #tpu.memory_space<vmem>>, vector<1x128xf32>
    %5 = vector.broadcast %4 : vector<1x128xf32> to vector<16x128xf32>
    %6 = arith.addf %3, %5 : vector<16x128xf32>
    %cst_5 = arith.constant 0.000000e+00 : f32
    %7 = vector.broadcast %cst_5 : f32 to vector<16x128xf32>
    %8 = arith.maximumf %6, %7 : vector<16x128xf32>
    %9 = arith.truncf %8 : vector<16x128xf32> to vector<16x128xbf16>
    %c0_6 = arith.constant 0 : index
    %c0_7 = arith.constant 0 : index
    %10 = vector.load %arg4[%c0_6, %c0_7] : memref<128x128xbf16, #tpu.memory_space<vmem>>, vector<128x128xbf16>
    %cst_8 = arith.constant dense<0.000000e+00> : vector<16x128xf32>
    %11 = tpu.matmul %9, %10, %cst_8 {dimension_numbers = #tpu.dot_dimension_numbers<[1], [0], [0], [1], [0, 0, 1, 1], [], []>} : vector<16x128xbf16>, vector<128x128xbf16>, vector<16x128xf32> -> vector<16x128xf32>
    %c1 = arith.constant 1 : index
    %c0_9 = arith.constant 0 : index
    %12 = vector.load %arg11[%c1, %c0_9] : memref<8x128xf32, #tpu.memory_space<vmem>>, vector<1x128xf32>
    %13 = vector.broadcast %12 : vector<1x128xf32> to vector<16x128xf32>
    %14 = arith.addf %11, %13 : vector<16x128xf32>
    %cst_10 = arith.constant 0.000000e+00 : f32
    %15 = vector.broadcast %cst_10 : f32 to vector<16x128xf32>
    %16 = arith.maximumf %14, %15 : vector<16x128xf32>
    %17 = arith.truncf %16 : vector<16x128xf32> to vector<16x128xbf16>
    %c0_11 = arith.constant 0 : index
    %c0_12 = arith.constant 0 : index
    %18 = vector.load %arg5[%c0_11, %c0_12] : memref<128x128xbf16, #tpu.memory_space<vmem>>, vector<128x128xbf16>
    %cst_13 = arith.constant dense<0.000000e+00> : vector<16x128xf32>
    %19 = tpu.matmul %17, %18, %cst_13 {dimension_numbers = #tpu.dot_dimension_numbers<[1], [0], [0], [1], [0, 0, 1, 1], [], []>} : vector<16x128xbf16>, vector<128x128xbf16>, vector<16x128xf32> -> vector<16x128xf32>
    %c2 = arith.constant 2 : index
    %c0_14 = arith.constant 0 : index
    %20 = vector.load %arg11[%c2, %c0_14] : memref<8x128xf32, #tpu.memory_space<vmem>>, vector<1x128xf32>
    %21 = vector.broadcast %20 : vector<1x128xf32> to vector<16x128xf32>
    %22 = arith.addf %19, %21 : vector<16x128xf32>
    %23 = vector.extract_strided_slice %22 {offsets = [0, 0], sizes = [8, 128], strides = [1, 1]} : vector<16x128xf32> to vector<8x128xf32>
    %24 = vector.extract_strided_slice %22 {offsets = [8, 0], sizes = [8, 128], strides = [1, 1]} : vector<16x128xf32> to vector<8x128xf32>
    %25 = arith.truncf %23 : vector<8x128xf32> to vector<8x128xbf16>
    %c0_15 = arith.constant 0 : index
    %c0_16 = arith.constant 0 : index
    %26 = vector.load %arg6[%c0_15, %c0_16] : memref<128x256xbf16, #tpu.memory_space<vmem>>, vector<128x256xbf16>
    %cst_17 = arith.constant dense<0.000000e+00> : vector<8x256xf32>
    %27 = tpu.matmul %25, %26, %cst_17 {dimension_numbers = #tpu.dot_dimension_numbers<[1], [0], [0], [1], [0, 0, 1, 1], [], []>} : vector<8x128xbf16>, vector<128x256xbf16>, vector<8x256xf32> -> vector<8x256xf32>
    %28 = vector.extract_strided_slice %27 {offsets = [0, 0], sizes = [8, 128], strides = [1, 1]} : vector<8x256xf32> to vector<8x128xf32>
    %29 = arith.truncf %24 : vector<8x128xf32> to vector<8x128xbf16>
    %c0_18 = arith.constant 0 : index
    %c0_19 = arith.constant 0 : index
    %30 = vector.load %arg7[%c0_18, %c0_19] : memref<128x128xbf16, #tpu.memory_space<vmem>>, vector<128x128xbf16>
    %cst_20 = arith.constant dense<0.000000e+00> : vector<8x128xf32>
    %31 = tpu.matmul %29, %30, %cst_20 {dimension_numbers = #tpu.dot_dimension_numbers<[1], [0], [0], [1], [0, 0, 1, 1], [], []>} : vector<8x128xbf16>, vector<128x128xbf16>, vector<8x128xf32> -> vector<8x128xf32>
    %32 = arith.addf %28, %31 : vector<8x128xf32>
    %c3 = arith.constant 3 : index
    %c0_21 = arith.constant 0 : index
    %33 = vector.load %arg11[%c3, %c0_21] : memref<8x128xf32, #tpu.memory_space<vmem>>, vector<1x128xf32>
    %34 = vector.broadcast %33 : vector<1x128xf32> to vector<8x128xf32>
    %35 = arith.addf %32, %34 : vector<8x128xf32>
    %cst_22 = arith.constant 0.000000e+00 : f32
    %36 = vector.broadcast %cst_22 : f32 to vector<8x128xf32>
    %37 = arith.maximumf %35, %36 : vector<8x128xf32>
    %38 = arith.truncf %37 : vector<8x128xf32> to vector<8x128xbf16>
    %c0_23 = arith.constant 0 : index
    %c0_24 = arith.constant 0 : index
    %39 = vector.load %arg8[%c0_23, %c0_24] : memref<128x128xbf16, #tpu.memory_space<vmem>>, vector<128x128xbf16>
    %cst_25 = arith.constant dense<0.000000e+00> : vector<8x128xf32>
    %40 = tpu.matmul %38, %39, %cst_25 {dimension_numbers = #tpu.dot_dimension_numbers<[1], [0], [0], [1], [0, 0, 1, 1], [], []>} : vector<8x128xbf16>, vector<128x128xbf16>, vector<8x128xf32> -> vector<8x128xf32>
    %c4 = arith.constant 4 : index
    %c0_26 = arith.constant 0 : index
    %41 = vector.load %arg11[%c4, %c0_26] : memref<8x128xf32, #tpu.memory_space<vmem>>, vector<1x128xf32>
    %42 = vector.broadcast %41 : vector<1x128xf32> to vector<8x128xf32>
    %43 = arith.addf %40, %42 : vector<8x128xf32>
    %44 = vector.extract_strided_slice %27 {offsets = [0, 128], sizes = [8, 128], strides = [1, 1]} : vector<8x256xf32> to vector<8x128xf32>
    %c0_27 = arith.constant 0 : index
    %c0_28 = arith.constant 0 : index
    %45 = vector.load %arg2[%c0_27, %c0_28] : memref<8x4xf32, #tpu.memory_space<vmem>>, vector<8x4xf32>
    %46 = arith.truncf %45 : vector<8x4xf32> to vector<8x4xbf16>
    %c0_29 = arith.constant 0 : index
    %c0_30 = arith.constant 0 : index
    %47 = vector.load %arg9[%c0_29, %c0_30] : memref<4x128xbf16, #tpu.memory_space<vmem>>, vector<4x128xbf16>
    %cst_31 = arith.constant dense<0.000000e+00> : vector<8x128xf32>
    %48 = tpu.matmul %46, %47, %cst_31 {dimension_numbers = #tpu.dot_dimension_numbers<[1], [0], [0], [1], [0, 0, 1, 1], [], []>} : vector<8x4xbf16>, vector<4x128xbf16>, vector<8x128xf32> -> vector<8x128xf32>
    %49 = arith.addf %44, %48 : vector<8x128xf32>
    %c5 = arith.constant 5 : index
    %c0_32 = arith.constant 0 : index
    %50 = vector.load %arg11[%c5, %c0_32] : memref<8x128xf32, #tpu.memory_space<vmem>>, vector<1x128xf32>
    %51 = vector.broadcast %50 : vector<1x128xf32> to vector<8x128xf32>
    %52 = arith.addf %49, %51 : vector<8x128xf32>
    %cst_33 = arith.constant 0.000000e+00 : f32
    %53 = vector.broadcast %cst_33 : f32 to vector<8x128xf32>
    %54 = arith.maximumf %52, %53 : vector<8x128xf32>
    %55 = arith.truncf %54 : vector<8x128xf32> to vector<8x128xbf16>
    %c0_34 = arith.constant 0 : index
    %c0_35 = arith.constant 0 : index
    %56 = vector.load %arg10[%c0_34, %c0_35] : memref<128x128xbf16, #tpu.memory_space<vmem>>, vector<128x128xbf16>
    %cst_36 = arith.constant dense<0.000000e+00> : vector<8x128xf32>
    %57 = tpu.matmul %55, %56, %cst_36 {dimension_numbers = #tpu.dot_dimension_numbers<[1], [0], [0], [1], [0, 0, 1, 1], [], []>} : vector<8x128xbf16>, vector<128x128xbf16>, vector<8x128xf32> -> vector<8x128xf32>
    %c6 = arith.constant 6 : index
    %c0_37 = arith.constant 0 : index
    %58 = vector.load %arg11[%c6, %c0_37] : memref<8x128xf32, #tpu.memory_space<vmem>>, vector<1x128xf32>
    %59 = vector.broadcast %58 : vector<1x128xf32> to vector<8x128xf32>
    %60 = arith.addf %57, %59 : vector<8x128xf32>
    %c0_38 = arith.constant 0 : index
    %c0_39 = arith.constant 0 : index
    %61 = vector.load %arg12[%c0_38, %c0_39] : memref<8x384xf32, #tpu.memory_space<vmem>>, vector<8x128xf32>
    tpu.vector_store %arg12[%c0_38, %c0_39], %60 {strides = array<i32>} : memref<8x384xf32, #tpu.memory_space<vmem>>, vector<8x128xf32>,
    %c0_40 = arith.constant 0 : index
    %c128 = arith.constant 128 : index
    %62 = vector.load %arg12[%c0_40, %c128] : memref<8x384xf32, #tpu.memory_space<vmem>>, vector<8x128xf32>
    tpu.vector_store %arg12[%c0_40, %c128], %24 {strides = array<i32>} : memref<8x384xf32, #tpu.memory_space<vmem>>, vector<8x128xf32>,
    %c0_41 = arith.constant 0 : index
    %c256 = arith.constant 256 : index
    %63 = vector.load %arg12[%c0_41, %c256] : memref<8x384xf32, #tpu.memory_space<vmem>>, vector<8x128xf32>
    tpu.vector_store %arg12[%c0_41, %c256], %43 {strides = array<i32>} : memref<8x384xf32, #tpu.memory_space<vmem>>, vector<8x128xf32>,
    return
  }
  func.func @transform_0(%arg0: i32) -> (i32, i32) {
    %c0_i32 = arith.constant 0 : i32
    %c0_i32_0 = arith.constant 0 : i32
    return %arg0, %c0_i32 : i32, i32
  }
  func.func @transform_1(%arg0: i32) -> (i32, i32) {
    %c0_i32 = arith.constant 0 : i32
    %c0_i32_0 = arith.constant 0 : i32
    return %arg0, %c0_i32 : i32, i32
  }
  func.func @transform_2(%arg0: i32) -> (i32, i32) {
    %c0_i32 = arith.constant 0 : i32
    %c0_i32_0 = arith.constant 0 : i32
    %c0_i32_1 = arith.constant 0 : i32
    return %c0_i32, %c0_i32_0 : i32, i32
  }
  func.func @transform_3(%arg0: i32) -> (i32, i32) {
    %c0_i32 = arith.constant 0 : i32
    %c0_i32_0 = arith.constant 0 : i32
    %c0_i32_1 = arith.constant 0 : i32
    return %c0_i32, %c0_i32_0 : i32, i32
  }
  func.func @transform_4(%arg0: i32) -> (i32, i32) {
    %c0_i32 = arith.constant 0 : i32
    %c0_i32_0 = arith.constant 0 : i32
    %c0_i32_1 = arith.constant 0 : i32
    return %c0_i32, %c0_i32_0 : i32, i32
  }
  func.func @transform_5(%arg0: i32) -> (i32, i32) {
    %c0_i32 = arith.constant 0 : i32
    %c0_i32_0 = arith.constant 0 : i32
    %c0_i32_1 = arith.constant 0 : i32
    return %c0_i32, %c0_i32_0 : i32, i32
  }
  func.func @transform_6(%arg0: i32) -> (i32, i32) {
    %c0_i32 = arith.constant 0 : i32
    %c0_i32_0 = arith.constant 0 : i32
    %c0_i32_1 = arith.constant 0 : i32
    return %c0_i32, %c0_i32_0 : i32, i32
  }
  func.func @transform_7(%arg0: i32) -> (i32, i32) {
    %c0_i32 = arith.constant 0 : i32
    %c0_i32_0 = arith.constant 0 : i32
    %c0_i32_1 = arith.constant 0 : i32
    return %c0_i32, %c0_i32_0 : i32, i32
  }
  func.func @transform_8(%arg0: i32) -> (i32, i32) {
    %c0_i32 = arith.constant 0 : i32
    %c0_i32_0 = arith.constant 0 : i32
    %c0_i32_1 = arith.constant 0 : i32
    return %c0_i32, %c0_i32_0 : i32, i32
  }
  func.func @transform_9(%arg0: i32) -> (i32, i32) {
    %c0_i32 = arith.constant 0 : i32
    %c0_i32_0 = arith.constant 0 : i32
    %c0_i32_1 = arith.constant 0 : i32
    return %c0_i32, %c0_i32_0 : i32, i32
  }
  func.func @transform_10(%arg0: i32) -> (i32, i32) {
    %c0_i32 = arith.constant 0 : i32
    %c0_i32_0 = arith.constant 0 : i32
    %c0_i32_1 = arith.constant 0 : i32
    return %c0_i32, %c0_i32_0 : i32, i32
  }
  func.func @transform_11(%arg0: i32) -> (i32, i32) {
    %c0_i32 = arith.constant 0 : i32
    %c0_i32_0 = arith.constant 0 : i32
    return %arg0, %c0_i32 : i32, i32
  }
}

</mosaic_0001>

<bundles_post_ra>
// kernel: icm_forward.1
= control target key start
LH: loop header
LB: loop body
LE: loop exit
PB: predicated region body
PF: predicated region fallthrough
CT: control target
= control target key end

     0   :  { %16 = vsyncpa [#allocation3], 0  ;;  %s2329_s0 = inlined_call_operand.vmem [shape: f32[32,16], index: 0, kind: input, shape index: {}]   ;;  %s2330_s1 = inlined_call_operand.vmem [shape: f32[16,4], index: 1, kind: input, shape index: {}]   ;;  %s2331_s2 = inlined_call_operand.vmem [shape: bf16[16,128], index: 2, kind: input, shape index: {}]   ;;  %s2332_s3 = inlined_call_operand.vmem [shape: bf16[128,128], index: 3, kind: input, shape index: {}]   ;;  %s2333_s4 = inlined_call_operand.hbm [shape: bf16[128,128], index: 4, kind: input, shape index: {}]   ;;  %s2334_s5 = inlined_call_operand.hbm [shape: bf16[128,256], index: 5, kind: input, shape index: {}]   ;;  %s2335_s6 = inlined_call_operand.hbm [shape: bf16[128,128], index: 6, kind: input, shape index: {}]   ;;  %s2336_s7 = inlined_call_operand.hbm [shape: bf16[128,128], index: 7, kind: input, shape index: {}]   ;;  %s2337_s8 = inlined_call_operand.vmem [shape: bf16[4,128], index: 8, kind: input, shape index: {}]   ;;  %s2338_s9 = inlined_call_operand.hbm [shape: bf16[128,128], index: 9, kind: input, shape index: {}]   ;;  %s2339_s10 = inlined_call_operand.vmem [shape: f32[8,128], index: 10, kind: input, shape index: {}]   ;;  %s2340_s11 = inlined_call_operand.vmem [shape: f32[16,384], index: 11, kind: output, shape index: {}]  }
   0x1   :  { %17 = vsyncpa [#allocation5], 0 }
   0x2   :  { %18 = vsyncpa [#allocation8], 0  ;;  %s2029_s17 = smov 0  }
   0x3 LB: > { %s1957_s18 = smov [#allocation4]   ;;  %s2035_s20 = sadd.s32 4294967295, %s1955_s17   ;;  %s1955_s17 = sphi %s2029_s17, %s24_s17  }
   0x4   : > { %s327_s19 = sshll.u32 %s1957_s18, 4  ;;  %p1419_p0 = scmp.ge.s32.totalorder %s1955_s17, 1  ;;  %s2040_s19 = int_to_ptr.vmem [resolvable:$true] %s327_s19 }
   0x5   : > { %p296_p1 = scmp.lt.s32.totalorder %s1955_s17, 3  ;;  %p2341_p2 = scmp.eq.s32.totalorder %s2035_s20, 0 }
   0x6   : > { %s1958_s23 = smov [#allocation7]   ;;  %s1959_s25 = smov [#allocation2]  }
   0x7   : > { %p2042_p3 = pnand %p1419_p0, %p296_p1  ;;  %s353_s24 = sshll.u32 %s1958_s23, 4  ;;  %s2054_s24 = int_to_ptr.vmem [resolvable:$true] %s353_s24 }
   0x8   : > { %s314_s26 = sshll.u32 %s1959_s25, 4  ;;  %s1797_s29 = scalar_lea.hbm %s2334_s5, 2048  ;;  %s2056_s26 = int_to_ptr.vmem [resolvable:$true] %s314_s26 }
   0x9   : > { %s2343_s21 = scalar_select %p2042_p3, 1, 0 }
   0xa   : > { %p1686_p4 = pneg %p2042_p3  ;;  %p1798_p6 = scmp.ne.s32.totalorder %s2334_s5, %s1797_s29 }
   0xb   : > { %p1804_p10 = scmp.lt.u32.totalorder %s1797_s29, %s2334_s5 }
   0xc   : > { %p2050_p5 = pnand %p2341_p2, %p1686_p4 }
   0xe   : > { %p2066_p7 = pneg %p2050_p5 }
  0x10   : > { %p1800_p8 = pnand %p2066_p7, %p1798_p6 }
  0x12   : > { %p1801_p9 = pneg %p1800_p8 }
  0x14   : > { %p1806_p11 = pnand %p1804_p10, %p1801_p9 }
  0x16   : > { %1809 = shalt.err (!%p1806_p11)
}
  0x17   : > { %s1810_s16 = scalar_lea.vmem %s2040_s19, 2048  ;;  %p1818_p1 = scmp.lt.s32.totalorder %s2040_s19, %s2040_s19 }
  0x18   : > { %p1811_p12 = scmp.ne.s32.totalorder %s2040_s19, %s1810_s16  ;;  %p1819_p4 = scmp.lt.s32.totalorder %s1810_s16, %s1810_s16 }
  0x1a   : > { %p1813_p13 = pnand %p1811_p12, %p2066_p7  ;;  %p1820_p6 = por %p1819_p4, %p1818_p1 }
  0x1c   : > { %p1814_p0 = pneg %p1813_p13 }
  0x1e   : > { %p1821_p8 = pnand %p1820_p6, %p1814_p0 }
  0x20   : > { %1824 = shalt.err (!%p1821_p8)
}
  0x21   : > { %s1960_s18 = smov 128   ;;  %s1961_s23 = smov 8  }
  0x22   : > { %1692 = dma.hbm_to_vmem [thread:$0]  (!%p2050_p5), %s2334_s5, 2048, %s2040_s19, [#allocation5], %s1960_s18, %s1960_s18, %s1961_s23  }
  0x23   : > { %s1825_s30 = scalar_lea.hbm %s2336_s7, 1024 }
  0x24   : > { %p1826_p9 = scmp.ne.s32.totalorder %s2336_s7, %s1825_s30  ;;  %p1832_p12 = scmp.lt.u32.totalorder %s1825_s30, %s2336_s7 }
  0x26   : > { %p1828_p10 = pnand %p1826_p9, %p2066_p7 }
  0x28   : > { %p1829_p11 = pneg %p1828_p10 }
  0x2a   : > { %p1834_p13 = pnand %p1832_p12, %p1829_p11 }
  0x2c   : > { %1837 = shalt.err (!%p1834_p13)
}
  0x2d   : > { %s1838_s19 = scalar_lea.vmem %s2054_s24, 1024  ;;  %p1846_p6 = scmp.lt.s32.totalorder %s2054_s24, %s2054_s24 }
  0x2e   : > { %p1839_p0 = scmp.ne.s32.totalorder %s2054_s24, %s1838_s19  ;;  %p1847_p8 = scmp.lt.s32.totalorder %s1838_s19, %s1838_s19 }
  0x30   : > { %p1841_p1 = pnand %p1839_p0, %p2066_p7  ;;  %p1848_p9 = por %p1847_p8, %p1846_p6 }
  0x32   : > { %p1842_p4 = pneg %p1841_p1 }
  0x34   : > { %p1849_p10 = pnand %p1848_p9, %p1842_p4 }
  0x36   : > { %1852 = shalt.err (!%p1849_p10)
}
  0x37   : > { %s1962_s18 = smov 64   ;;  %s1963_s23 = smov 4  }
  0x38   : > { %1698 = dma.hbm_to_vmem [thread:$0]  (!%p2050_p5), %s2336_s7, 1024, %s2054_s24, [#allocation8], %s1962_s18, %s1962_s18, %s1963_s23  }
  0x39   : > { %s1853_s30 = scalar_lea.hbm %s2333_s4, 1024 }
  0x3a   : > { %p1854_p11 = scmp.ne.s32.totalorder %s2333_s4, %s1853_s30  ;;  %p1860_p0 = scmp.lt.u32.totalorder %s1853_s30, %s2333_s4 }
  0x3c   : > { %p1856_p12 = pnand %p1854_p11, %p2066_p7 }
  0x3e   : > { %p1857_p13 = pneg %p1856_p12 }
  0x40   : > { %p1862_p1 = pnand %p1860_p0, %p1857_p13 }
  0x42   : > { %1865 = shalt.err (!%p1862_p1)
}
  0x43   : > { %s1866_s24 = scalar_lea.vmem %s2056_s26, 1024  ;;  %p1874_p9 = scmp.lt.s32.totalorder %s2056_s26, %s2056_s26 }
  0x44   : > { %p1867_p4 = scmp.ne.s32.totalorder %s2056_s26, %s1866_s24  ;;  %p1875_p10 = scmp.lt.s32.totalorder %s1866_s24, %s1866_s24 }
  0x46   : > { %p1869_p6 = pnand %p1867_p4, %p2066_p7  ;;  %p1876_p11 = por %p1875_p10, %p1874_p9 }
  0x48   : > { %p1870_p8 = pneg %p1869_p6 }
  0x4a   : > { %p1877_p12 = pnand %p1876_p11, %p1870_p8 }
  0x4c   : > { %1880 = shalt.err (!%p1877_p12)
}
  0x4d   : > { %1689 = dma.hbm_to_vmem [thread:$0]  (!%p2050_p5), %s2333_s4, 1024, %s2056_s26, [#allocation3], %s1962_s18, %s1962_s18, %s1963_s23  }
  0x4e   : > { %s1964_s27 = smov [#allocation6]   ;;  %s1965_s29 = smov [#allocation9]  }
  0x4f   : > { %s340_s28 = sshll.u32 %s1964_s27, 4  ;;  %s369_s30 = sshll.u32 %s1965_s29, 4  ;;  %s341_s28 = int_to_ptr.vmem [resolvable:$true] %s340_s28  ;;  %s2139_s30 = int_to_ptr.vmem [resolvable:$true] %s369_s30 }
  0x50   : > { %s1881_s15 = scalar_lea.hbm %s2335_s6, 1024 }
  0x51   : > { %p1882_p13 = scmp.ne.s32.totalorder %s2335_s6, %s1881_s15  ;;  %p1888_p4 = scmp.lt.u32.totalorder %s1881_s15, %s2335_s6 }
  0x53   : > { %p1884_p0 = pnand %p1882_p13, %p2066_p7 }
  0x55   : > { %p1885_p1 = pneg %p1884_p0 }
  0x57   : > { %p1890_p6 = pnand %p1888_p4, %p1885_p1 }
  0x59   : > { %1893 = shalt.err (!%p1890_p6)
}
  0x5a   : > { %s1894_s25 = scalar_lea.vmem %s341_s28, 1024  ;;  %p1902_p11 = scmp.lt.s32.totalorder %s341_s28, %s341_s28 }
  0x5b   : > { %p1895_p8 = scmp.ne.s32.totalorder %s341_s28, %s1894_s25  ;;  %p1903_p12 = scmp.lt.s32.totalorder %s1894_s25, %s1894_s25 }
  0x5d   : > { %p1897_p9 = pnand %p1895_p8, %p2066_p7  ;;  %p1904_p2 = por %p1903_p12, %p1902_p11 }
  0x5f   : > { %p1898_p10 = pneg %p1897_p9 }
  0x61   : > { %p1905_p3 = pnand %p1904_p2, %p1898_p10 }
  0x63   : > { %1908 = shalt.err (!%p1905_p3)
}
  0x64   : > { %1695 = dma.hbm_to_vmem [thread:$0]  (!%p2050_p5), %s2335_s6, 1024, %s341_s28, [#allocation5], %s1962_s18, %s1962_s18, %s1963_s23  }
  0x65   : > { %s1909_s15 = scalar_lea.hbm %s2338_s9, 1024 }
  0x66   : > { %p1910_p13 = scmp.ne.s32.totalorder %s2338_s9, %s1909_s15  ;;  %p1916_p0 = scmp.lt.u32.totalorder %s1909_s15, %s2338_s9 }
  0x68   : > { %p1912_p2 = pnand %p1910_p13, %p2066_p7 }
  0x6a   : > { %p1913_p3 = pneg %p1912_p2 }
  0x6c   : > { %p1918_p1 = pnand %p1916_p0, %p1913_p3 }
  0x6e   : > { %1921 = shalt.err (!%p1918_p1)
}
  0x6f   : > { %s1922_s28 = scalar_lea.vmem %s2139_s30, 1024  ;;  %p1930_p9 = scmp.lt.s32.totalorder %s2139_s30, %s2139_s30 }
  0x70   : > { %p1923_p4 = scmp.ne.s32.totalorder %s2139_s30, %s1922_s28  ;;  %p1931_p10 = scmp.lt.s32.totalorder %s1922_s28, %s1922_s28 }
  0x72   : > { %p1925_p6 = pnand %p1923_p4, %p2066_p7  ;;  %p1932_p11 = por %p1931_p10, %p1930_p9 }
  0x74   : > { %p1926_p8 = pneg %p1925_p6 }
  0x76   : > { %p1933_p12 = pnand %p1932_p11, %p1926_p8 }
  0x78   : > { %1936 = shalt.err (!%p1933_p12)
}
  0x79   : > { %1701 = dma.hbm_to_vmem [thread:$0]  (!%p2050_p5), %s2338_s9, 1024, %s2139_s30, [#allocation8], %s1962_s18, %s1962_s18, %s1963_s23  }
  0x7a   : > { %p2346_p13 = scmp.ne.s32.totalorder %s2343_s21, 0 }
  0x7b   : > { %p2347_p7 = scmp.eq.s32.totalorder (!%p2346_p13), %s2035_s20, 0 }
  0x7c   : > { %404 = sbr.rel (%p2346_p13) target bundleno = 1249 (0x4e1), region = 64 }
  0x83   : > { %1942 = dma.done.wait (%p2347_p7), [#allocation3], 1024   ;;  %p2348_p2 = pmov %p2347_p7 }
  0x85   : > { %1944 = vsyncadd (%p2348_p2), [#allocation3], 4294966272  ;;  %p2349_p3 = pmov %p2348_p2 }
  0x86   : > { %p2350_p0 = pmov %p2348_p2 }
  0x87   : > { %1946 = dma.done.wait (%p2349_p3), [#allocation5], 3072  }
  0x88   : > { %1948 = vsyncadd (%p2350_p0), [#allocation5], 4294964224  ;;  %p2351_p1 = pmov %p2350_p0 }
  0x89   : > { %p2352_p5 = pmov %p2350_p0 }
  0x8a   : > { %1950 = dma.done.wait (%p2351_p1), [#allocation8], 2048  }
  0x8b   : > { %1952 = vsyncadd (%p2352_p5), [#allocation8], 4294965248  ;;  %s1432_s21 = sshll.u32 %s2035_s20, 1  ;;  %v1966_v0 = vmov 0.0   ;;  %vm1967_vm0 = vmmov 0   ;;  %v1732_v1 = vld [vmem:[%s2331_s2] sm:$0xff]  }
  0x8c   : > { %1553 = vmatprep.subr.bf16.mxu1 %v1966_v0  ;;  %1555 = vmatprep.mubr.msk.bf16.mxu1 %vm1967_vm0, %v1966_v0  ;;  %p465_p4 = scmp.lt.s32.totalorder %s1432_s21, 3  ;;  %vm496_vm1 = vcmask 130048   ;;  %v1733_v5 = vld [vmem:[%s2332_s3] sm:$0xff]   ;;  %v1734_v6 = vld [vmem:[%s2332_s3 + $0x8] sm:$0xff]   ;;  %v1735_v7 = vld [vmem:[%s2332_s3 + $0x10] sm:$0xff]   ;;  %p470_p6 = scmp.lt.s32.totalorder %s2035_s20, 1 }
  0x8d   : > { %1579 = vmatprep.subr.bf16.mxu0 %v1966_v0  ;;  %1595 = vmatprep.mubr.msk.bf16.mxu0 %vm1967_vm0, %v1966_v0  ;;  %v1736_v8 = vld [vmem:[%s2332_s3 + $0x18] sm:$0xff]   ;;  %v1737_v9 = vld [vmem:[%s2332_s3 + $0x20] sm:$0xff]   ;;  %v1738_v10 = vld [vmem:[%s2332_s3 + $0x28] sm:$0xff]   ;;  %vm1135_vm2 = vcmask 1041408   ;;  %vm1131_vm3 = vcmask 31744  }
  0x8e   : > { %s2354_s21 = smov (!%p465_p4, %s1432_s21), 3  ;;  %1554 = vmatpush3.bf16.msra.mxu1 %v1732_v1  ;;  %v1739_v11 = vld [vmem:[%s2332_s3 + $0x30] sm:$0xff]   ;;  %v1740_v12 = vld [vmem:[%s2332_s3 + $0x38] sm:$0xff]   ;;  %v1741_v13 = vld [vmem:[#allocation2] sm:$0xff]   ;;  %s2356_s20 = smov (!%p470_p6, %s2035_s20), 1 }
  0x8f   : > { %s1433_s22 = sshll.u32 %s2354_s21, 3  ;;  %1559 = vmatprep.subr.bf16.mxu1 %v1966_v0  ;;  %1580 = vmatpush3.bf16.msra.mxu0 %v1741_v13  ;;  %v1742_v14 = vld [vmem:[#allocation2 + $0x8] sm:$0xff]   ;;  %v1743_v15 = vld [vmem:[#allocation2 + $0x10] sm:$0xff]   ;;  %v1744_v16 = vld [vmem:[#allocation2 + $0x18] sm:$0xff]   ;;  %s1665_s19 = smul.u32 24, %s2356_s20 }
  0x90   : > { %s468_s23 = scalar_lea.vmem %s2329_s0, %s1433_s22  ;;  %1581 = vmatprep.subr.bf16.mxu0 %v1966_v0  ;;  %v1745_v17 = vld [vmem:[#allocation2 + $0x20] sm:$0xff]   ;;  %v1746_v18 = vld [vmem:[#allocation2 + $0x28] sm:$0xff]   ;;  %v1747_v29 = vld [vmem:[#allocation2 + $0x30] sm:$0xff]   ;;  %s1434_s26 = sshll.u32 %s2356_s20, 3 }
  0x91   : > { %v480_v2 = vld [vmem:[%s468_s23] sm:$0xff]  ;;  %v481_v3 = vld [vmem:[%s468_s23 + $0x8] sm:$0xff]  ;;  %v1748_v30 = vld [vmem:[#allocation2 + $0x38] sm:$0xff]   ;;  %s2282_s27 = scalar_lea.vmem %s2340_s11, %s1665_s19  ;;  %s473_s20 = scalar_lea.vmem %s2330_s1, %s1434_s26 }
  0x92   : > { %v482_v4 = vpack.c.bf16 %v481_v3, %v480_v2  ;;  %v1436_v19 = vld [vmem:[%s2339_s10] ss:$0 sm:$0xff]  ;;  %v1751_v32 = vld [vmem:[#allocation4 + $0x4] ss:$8 sps:$4 sm:$0xff]   ;;  %v1755_v33 = vld [vmem:[#allocation4 + $0x14] ss:$8 sps:$4 sm:$0xff]  }
  0x93   : > { %1582 = vmatpush3.bf16.msra.mxu0 %v1742_v14  ;;  %v1749_v31 = vld [vmem:[#allocation4] ss:$8 sps:$4 sm:$0xff]   ;;  %v1753_v34 = vld [vmem:[#allocation4 + $0x10] ss:$8 sps:$4 sm:$0xff]   ;;  %v1759_v35 = vld [vmem:[#allocation4 + $0x24] ss:$8 sps:$4 sm:$0xff]  }
  0x94   : > { %1556 = vmatmul.mubr.msk.bf16.vlgmr.msra.gmra.mrb[0].mxu1 %vm496_vm1, %v482_v4  ;;  %1583 = vmatprep.subr.bf16.mxu0 %v1966_v0  ;;  %v1757_v36 = vld [vmem:[#allocation4 + $0x20] ss:$8 sps:$4 sm:$0xff]   ;;  %v1763_v37 = vld [vmem:[#allocation4 + $0x34] ss:$8 sps:$4 sm:$0xff]   ;;  %v1761_v38 = vld [vmem:[#allocation4 + $0x30] ss:$8 sps:$4 sm:$0xff]  }
  0x95   : > { %1560 = vmatpush3.bf16.msra.mxu1 %v1733_v5  ;;  %1575 = vmatprep.mubr.msk.bf16.mxu1 %vm1967_vm0, %v1966_v0  ;;  %v1767_v39 = vld [vmem:[#allocation4 + $0x44] ss:$8 sps:$4 sm:$0xff]   ;;  %v1765_v40 = vld [vmem:[#allocation4 + $0x40] ss:$8 sps:$4 sm:$0xff]   ;;  %v1771_v41 = vld [vmem:[#allocation4 + $0x54] ss:$8 sps:$4 sm:$0xff]  }
  0x96   : > { %1561 = vmatprep.subr.bf16.mxu1 %v1966_v0  ;;  %v1769_v42 = vld [vmem:[#allocation4 + $0x50] ss:$8 sps:$4 sm:$0xff]   ;;  %v1775_v43 = vld [vmem:[#allocation4 + $0x64] ss:$8 sps:$4 sm:$0xff]   ;;  %v1773_v44 = vld [vmem:[#allocation4 + $0x60] ss:$8 sps:$4 sm:$0xff]  }
  0x97   : > { %1584 = vmatpush3.bf16.msra.mxu0 %v1743_v15  ;;  %v1439_v45 = vld [vmem:[%s2339_s10 + $0x1] ss:$0 sm:$0xff]  ;;  %v1756_v56 = vld [vmem:[#allocation6 + $0x8] sm:$0xff]   ;;  %v1760_v57 = vld [vmem:[#allocation6 + $0x10] sm:$0xff]   ;;  %v1968_v2 = vmov 0  }
  0x98   : > { %1585 = vmatprep.subr.bf16.mxu0 %v1966_v0  ;;  %v1752_v54 = vld [vmem:[#allocation6] sm:$0xff]   ;;  %v1764_v58 = vld [vmem:[#allocation6 + $0x18] sm:$0xff]   ;;  %v1772_v60 = vld [vmem:[#allocation6 + $0x28] sm:$0xff]  }
  0x99   : > { %1562 = vmatpush3.bf16.msra.mxu1 %v1734_v6  ;;  %v1768_v59 = vld [vmem:[#allocation6 + $0x20] sm:$0xff]   ;;  %v1776_v61 = vld [vmem:[#allocation6 + $0x30] sm:$0xff]   ;;  %v1780_v1 = vld [vmem:[#allocation6 + $0x38] sm:$0xff]  }
  0x9a   : > { %1563 = vmatprep.subr.bf16.mxu1 %v1966_v0  ;;  %v1779_v62 = vld [vmem:[#allocation4 + $0x74] ss:$8 sps:$4 sm:$0xff]   ;;  %v1777_v63 = vld [vmem:[#allocation4 + $0x70] ss:$8 sps:$4 sm:$0xff]   ;;  %v1448_v3 = vld [vmem:[%s2339_s10 + $0x2] ss:$0 sm:$0xff] }
  0x9b   : > { %1586 = vmatpush3.bf16.msra.mxu0 %v1744_v16  ;;  %v1782_v15 = vld [vmem:[#allocation7 + $0x8] sm:$0xff]   ;;  %v1128_v16 = vld [vmem:[%s473_s20] sm:$0xff] }
  0x9c   : > { %1587 = vmatprep.subr.bf16.mxu0 %v1966_v0 }
  0x9d   : > { %1564 = vmatpush3.bf16.msra.mxu1 %v1735_v7 }
  0x9e   : > { %1565 = vmatprep.subr.bf16.mxu1 %v1966_v0 }
  0x9f   : > { %1588 = vmatpush3.bf16.msra.mxu0 %v1745_v17  ;;  %v1783_v17 = vld [vmem:[#allocation7 + $0x10] sm:$0xff]  }
  0xa0   : > { %1589 = vmatprep.subr.bf16.mxu0 %v1966_v0 }
  0xa1   : > { %1566 = vmatpush3.bf16.msra.mxu1 %v1736_v8  ;;  %v1130_v8 = vld [vmem:[%s2337_s8] sm:$0x3] }
  0xa2   : > { %1567 = vmatprep.subr.bf16.mxu1 %v1966_v0  ;;  %v1137_v14 = vsel %vm1135_vm2, %v1130_v8, 0 }
  0xa3   : > { %1590 = vmatpush3.bf16.msra.mxu0 %v1746_v18  ;;  %v1129_v18 = vpack.c.bf16 %v1128_v16, %v1128_v16 }
  0xa4   : > { %1591 = vmatprep.subr.bf16.mxu0 %v1966_v0 }
  0xa5   : > { %1568 = vmatpush3.bf16.msra.mxu1 %v1737_v9  ;;  %v1781_v9 = vld [vmem:[#allocation7] sm:$0xff]  }
  0xa6   : > { %1569 = vmatprep.subr.bf16.mxu1 %v1966_v0 }
  0xa7   : > { %1592 = vmatpush3.bf16.msra.mxu0 %v1747_v29  ;;  %v1794_v29 = vld [vmem:[#allocation9 + $0x28] sm:$0xff]  }
  0xa8   : > { %1593 = vmatprep.subr.bf16.mxu0 %v1966_v0 }
  0xa9   : > { %1570 = vmatpush3.bf16.msra.mxu1 %v1738_v10 }
  0xaa   : > { %1571 = vmatprep.subr.bf16.mxu1 %v1966_v0 }
  0xab   : > { %1594 = vmatpush3.bf16.msra.mxu0 %v1748_v30  ;;  %v1795_v30 = vld [vmem:[#allocation9 + $0x30] sm:$0xff]  }
  0xac   : > { %1599 = vmatprep.subr.bf16.mxu0 %v1966_v0 }
  0xad   : > { %1572 = vmatpush3.bf16.msra.mxu1 %v1739_v11 }
  0xae   : > { %1573 = vmatprep.subr.bf16.mxu1 %v1966_v0 }
  0xb1   : > { %1574 = vmatpush3.bf16.msra.mxu1 %v1740_v12 }
  0xb2   : > { %864 = vmatprep.subr.bf16.mxu1 %v1751_v32 }
 0x167   : > { %v534_v20 = vpop.f32.mrb[0].mxu1 }
 0x168   : > { %v535_v21 = vadd.f32 %v1436_v19, %v534_v20  ;;  %v1557_v22 = vpop.f32.mrb[1].mxu1  ;;  %v1785_v20 = vld [vmem:[#allocation7 + $0x18] sm:$0xff]  }
 0x169   : > { %v537_v23 = vpop.f32.mrb[2].mxu1  ;;  %v1787_v22 = vld [vmem:[#allocation7 + $0x20] sm:$0xff]  }
 0x16a   : > { %v538_v24 = vadd.f32 %v1436_v19, %v537_v23  ;;  %v1558_v25 = vpop.f32.mrb[3].mxu1  ;;  %v541_v26 = vmax.f32 %v535_v21, 0.0  ;;  %v1784_v19 = vld [vmem:[#allocation9] sm:$0xff]   ;;  %v1786_v21 = vld [vmem:[#allocation9 + $0x8] sm:$0xff]   ;;  %v1788_v23 = vld [vmem:[#allocation9 + $0x10] sm:$0xff]  }
 0x16b   : > { %v1790_v25 = vld [vmem:[#allocation9 + $0x18] sm:$0xff]  }
 0x16c   : > { %v542_v27 = vmax.f32 %v538_v24, 0.0  ;;  %v1789_v24 = vld [vmem:[#allocation7 + $0x28] sm:$0xff]  }
 0x16e   : > { %v543_v28 = vpack.c.bf16 %v542_v27, %v541_v26  ;;  %v1791_v26 = vld [vmem:[#allocation7 + $0x30] sm:$0xff]   ;;  %v1792_v27 = vld [vmem:[#allocation9 + $0x20] sm:$0xff]  }
 0x170   : > { %1576 = vmatmul.mubr.bf16.vlgmr.msra.gmra.mrb[4].mxu1 %v543_v28  ;;  %v1793_v28 = vld [vmem:[#allocation7 + $0x38] sm:$0xff]  }
 0x171   : > { %865 = vmatpush1.bf16.msra.mxu1 %v1749_v31  ;;  %896 = vmatprep.mubr.bf16.mxu1 %v1968_v2  ;;  %v1796_v31 = vld [vmem:[#allocation9 + $0x38] sm:$0xff]  }
 0x172   : > { %866 = vmatprep.subr.bf16.mxu1 %v1755_v33 }
 0x175   : > { %867 = vmatpush1.bf16.msra.mxu1 %v1753_v34 }
 0x176   : > { %868 = vmatprep.subr.bf16.mxu1 %v1759_v35 }
 0x179   : > { %869 = vmatpush1.bf16.msra.mxu1 %v1757_v36  ;;  %v1481_v36 = vld [vmem:[%s2339_s10 + $0x3] ss:$0 sm:$0xff] }
 0x17a   : > { %870 = vmatprep.subr.bf16.mxu1 %v1763_v37 }
 0x17d   : > { %871 = vmatpush1.bf16.msra.mxu1 %v1761_v38 }
 0x17e   : > { %872 = vmatprep.subr.bf16.mxu1 %v1767_v39 }
 0x181   : > { %873 = vmatpush1.bf16.msra.mxu1 %v1765_v40 }
 0x182   : > { %874 = vmatprep.subr.bf16.mxu1 %v1771_v41 }
 0x185   : > { %875 = vmatpush1.bf16.msra.mxu1 %v1769_v42 }
 0x186   : > { %876 = vmatprep.subr.bf16.mxu1 %v1775_v43 }
 0x189   : > { %877 = vmatpush1.bf16.msra.mxu1 %v1773_v44 }
 0x18a   : > { %878 = vmatprep.subr.bf16.mxu1 %v1779_v62 }
 0x18d   : > { %879 = vmatpush1.bf16.msra.mxu1 %v1777_v63 }
 0x18e   : > { %1619 = vmatprep.subr.bf16.mxu1 %v1966_v0 }
 0x243   : > { %v647_v46 = vpop.f32.mrb[4].mxu1 }
 0x244   : > { %v648_v47 = vadd.f32 %v1439_v45, %v647_v46  ;;  %v1577_v48 = vpop.f32.mrb[5].mxu1 }
 0x245   : > { %v650_v49 = vpop.f32.mrb[6].mxu1 }
 0x246   : > { %v651_v50 = vadd.f32 %v1439_v45, %v650_v49  ;;  %v1578_v51 = vpop.f32.mrb[7].mxu1  ;;  %v654_v52 = vmax.f32 %v648_v47, 0.0 }
 0x248   : > { %v655_v53 = vmax.f32 %v651_v50, 0.0 }
 0x24a   : > { %v656_v55 = vpack.c.bf16 %v655_v53, %v654_v52  ;;  %v1482_v53 = vld [vmem:[%s2339_s10 + $0x4] ss:$0 sm:$0xff] }
 0x24c   : > { %1596 = vmatmul.mubr.bf16.vlgmr.msra.gmra.mrb[0].mxu0 %v656_v55 }
 0x24d   : > { %1600 = vmatpush3.bf16.msra.mxu0 %v1752_v54  ;;  %1615 = vmatprep.mubr.msk.bf16.mxu0 %vm1967_vm0, %v1966_v0 }
 0x24e   : > { %1601 = vmatprep.subr.bf16.mxu0 %v1966_v0 }
 0x251   : > { %1602 = vmatpush3.bf16.msra.mxu0 %v1756_v56 }
 0x252   : > { %1603 = vmatprep.subr.bf16.mxu0 %v1966_v0 }
 0x255   : > { %1604 = vmatpush3.bf16.msra.mxu0 %v1760_v57 }
 0x256   : > { %1605 = vmatprep.subr.bf16.mxu0 %v1966_v0 }
 0x259   : > { %1606 = vmatpush3.bf16.msra.mxu0 %v1764_v58 }
 0x25a   : > { %1607 = vmatprep.subr.bf16.mxu0 %v1966_v0 }
 0x25d   : > { %1608 = vmatpush3.bf16.msra.mxu0 %v1768_v59  ;;  %v1493_v59 = vld [vmem:[%s2339_s10 + $0x6] ss:$0 sm:$0xff] }
 0x25e   : > { %1609 = vmatprep.subr.bf16.mxu0 %v1966_v0 }
 0x261   : > { %1610 = vmatpush3.bf16.msra.mxu0 %v1772_v60 }
 0x262   : > { %1611 = vmatprep.subr.bf16.mxu0 %v1966_v0 }
 0x265   : > { %1612 = vmatpush3.bf16.msra.mxu0 %v1776_v61 }
 0x266   : > { %1613 = vmatprep.subr.bf16.mxu0 %v1966_v0 }
 0x269   : > { %1614 = vmatpush3.bf16.msra.mxu0 %v1780_v1 }
 0x26a   : > { %1639 = vmatprep.subr.bf16.mxu0 %v1966_v0 }
 0x31f   : > { %v760_v4 = vpop.f32.mrb[0].mxu0 }
 0x320   : > { %v761_v5 = vadd.f32 %v1448_v3, %v760_v4  ;;  %v1597_v6 = vpop.f32.mrb[1].mxu0 }
 0x321   : > { %v763_v7 = vpop.f32.mrb[2].mxu0 }
 0x322   : > { %v767_v10 = vpack.c.bf16 %v761_v5, %v761_v5  ;;  %v764_v11 = vadd.f32 %v1448_v3, %v763_v7  ;;  %v1598_v12 = vpop.f32.mrb[3].mxu0 }
 0x324   : > { %v905_v13 = vpack.c.bf16 %v764_v11, %v764_v11  ;;  %1298 = vst [vmem:[%s2282_s27 + $0x8] sm:$0xff] %v764_v11  ;;  %897 = vmatmul.mubr.bf16.vlgmr.msra.gmra.mrb[8].mxu1 %v767_v10 }
 0x325   : > { %1620 = vmatpush3.bf16.msra.mxu1 %v1781_v9  ;;  %1635 = vmatprep.mubr.msk.bf16.mxu1 %vm1967_vm0, %v1966_v0 }
 0x326   : > { %1616 = vmatmul.mubr.bf16.vlgmr.msra.gmra.mrb[4].mxu0 %v905_v13  ;;  %1621 = vmatprep.subr.bf16.mxu1 %v1966_v0 }
 0x327   : > { %1640 = vmatpush3.bf16.msra.mxu0 %v1137_v14  ;;  %1641 = vmatprep.mubr.msk.bf16.mxu0 %vm1967_vm0, %v1966_v0 }
 0x328   : > { %1645 = vmatprep.subr.bf16.mxu0 %v1966_v0 }
 0x329   : > { %1622 = vmatpush3.bf16.msra.mxu1 %v1782_v15 }
 0x32a   : > { %1623 = vmatprep.subr.bf16.mxu1 %v1966_v0 }
 0x32d   : > { %1624 = vmatpush3.bf16.msra.mxu1 %v1783_v17 }
 0x32e   : > { %1642 = vmatmul.mubr.msk.bf16.vlgmr.msra.gmra.mrb[8].mxu0 %vm1131_vm3, %v1129_v18  ;;  %1625 = vmatprep.subr.bf16.mxu1 %v1966_v0 }
 0x32f   : > { %1646 = vmatpush3.bf16.msra.mxu0 %v1784_v19  ;;  %1661 = vmatprep.mubr.msk.bf16.mxu0 %vm1967_vm0, %v1966_v0 }
 0x330   : > { %1647 = vmatprep.subr.bf16.mxu0 %v1966_v0 }
 0x331   : > { %1626 = vmatpush3.bf16.msra.mxu1 %v1785_v20 }
 0x332   : > { %1627 = vmatprep.subr.bf16.mxu1 %v1966_v0 }
 0x333   : > { %1648 = vmatpush3.bf16.msra.mxu0 %v1786_v21 }
 0x334   : > { %1649 = vmatprep.subr.bf16.mxu0 %v1966_v0 }
 0x335   : > { %1628 = vmatpush3.bf16.msra.mxu1 %v1787_v22 }
 0x336   : > { %1629 = vmatprep.subr.bf16.mxu1 %v1966_v0 }
 0x337   : > { %1650 = vmatpush3.bf16.msra.mxu0 %v1788_v23 }
 0x338   : > { %1651 = vmatprep.subr.bf16.mxu0 %v1966_v0 }
 0x339   : > { %1630 = vmatpush3.bf16.msra.mxu1 %v1789_v24 }
 0x33a   : > { %1631 = vmatprep.subr.bf16.mxu1 %v1966_v0 }
 0x33b   : > { %1652 = vmatpush3.bf16.msra.mxu0 %v1790_v25 }
 0x33c   : > { %1653 = vmatprep.subr.bf16.mxu0 %v1966_v0 }
 0x33d   : > { %1632 = vmatpush3.bf16.msra.mxu1 %v1791_v26 }
 0x33e   : > { %1633 = vmatprep.subr.bf16.mxu1 %v1966_v0 }
 0x33f   : > { %1654 = vmatpush3.bf16.msra.mxu0 %v1792_v27 }
 0x340   : > { %1655 = vmatprep.subr.bf16.mxu0 %v1966_v0 }
 0x341   : > { %1634 = vmatpush3.bf16.msra.mxu1 %v1793_v28 }
 0x343   : > { %1656 = vmatpush3.bf16.msra.mxu0 %v1794_v29 }
 0x344   : > { %1657 = vmatprep.subr.bf16.mxu0 %v1966_v0 }
 0x347   : > { %1658 = vmatpush3.bf16.msra.mxu0 %v1795_v30 }
 0x348   : > { %1659 = vmatprep.subr.bf16.mxu0 %v1966_v0  ;;  %v1492_v0 = vld [vmem:[%s2339_s10 + $0x5] ss:$0 sm:$0xff] }
 0x34b   : > { %1660 = vmatpush3.bf16.msra.mxu0 %v1796_v31 }
 0x3f7   : > { %v898_v32 = vpop.f32.mrb[8].mxu1 }
 0x3f8   : > { %v900_v33 = vpop.f32.mrb[9].mxu1 }
 0x3f9   : > { %v902_v34 = vpop.f32.mrb[10].mxu1  ;;  %v1004_v35 = vpop.f32.mrb[4].mxu0 }
 0x3fa   : > { %v1010_v37 = vadd.f32 %v1004_v35, %v898_v32  ;;  %v903_v38 = vpop.f32.mrb[11].mxu1  ;;  %v1617_v39 = vpop.f32.mrb[5].mxu0 }
 0x3fb   : > { %v1007_v40 = vpop.f32.mrb[6].mxu0 }
 0x3fc   : > { %v1016_v41 = vadd.f32 %v1481_v36, %v1010_v37  ;;  %v1618_v42 = vpop.f32.mrb[7].mxu0 }
 0x3fe   : > { %v1017_v43 = vmax.f32 %v1016_v41, 0.0 }
 0x400   : > { %v1018_v44 = vpack.c.bf16 %v1017_v43, %v1017_v43 }
 0x401   : > { %v1173_v45 = vpop.f32.mrb[8].mxu0 }
 0x402   : > { %v1179_v46 = vadd.f32 %v1173_v45, %v900_v33  ;;  %1636 = vmatmul.mubr.bf16.vlgmr.msra.gmra.mrb[12].mxu1 %v1018_v44  ;;  %v1643_v47 = vpop.f32.mrb[9].mxu0 }
 0x403   : > { %v1176_v48 = vpop.f32.mrb[10].mxu0 }
 0x404   : > { %v1185_v49 = vadd.f32 %v1492_v0, %v1179_v46  ;;  %v1644_v50 = vpop.f32.mrb[11].mxu0 }
 0x406   : > { %v1186_v51 = vmax.f32 %v1185_v49, 0.0 }
 0x408   : > { %v1187_v52 = vpack.c.bf16 %v1186_v51, %v1186_v51 }
 0x40a   : > { %1662 = vmatmul.mubr.bf16.vlgmr.msra.gmra.mrb[12].mxu0 %v1187_v52 }
 0x4d5   : > { %v1122_v54 = vpop.f32.mrb[12].mxu1 }
 0x4d6   : > { %v1123_v55 = vadd.f32 %v1482_v53, %v1122_v54  ;;  %v1637_v56 = vpop.f32.mrb[13].mxu1 }
 0x4d7   : > { %v1125_v57 = vpop.f32.mrb[14].mxu1 }
 0x4d8   : > { %1299 = vst [vmem:[%s2282_s27 + $0x10] sm:$0xff] %v1123_v55  ;;  %v1638_v58 = vpop.f32.mrb[15].mxu1 }
 0x4dd   : > { %v1291_v60 = vpop.f32.mrb[12].mxu0 }
 0x4de   : > { %v1292_v61 = vadd.f32 %v1493_v59, %v1291_v60  ;;  %v1663_v62 = vpop.f32.mrb[13].mxu0 }
 0x4df   : > { %v1294_v63 = vpop.f32.mrb[14].mxu0 }
 0x4e0   : > { %1297 = vst [vmem:[%s2282_s27] sm:$0xff] %v1292_v61  ;;  %v1664_v1 = vpop.f32.mrb[15].mxu0 }
 0x4e1 PF: > { %s24_s17 = sadd.s32 1, %s1955_s17  }
 0x4e2   : > { %p21_p8 = scmp.ge.s32.totalorder %s24_s17, 4  }
 0x4e4   :  { %23 = sbr.rel (!%p21_p8) target bundleno = 3 (0x3), region = 118 }
 0x4eb   :  { %1321 = vsyncpa [#allocation3], 1 }
 0x4ec   :  { %1323 = vsyncpa [#allocation3 + $0x1], 1 }
 0x4ed   :  { %1324 = vsyncpa [#allocation5], 1 }
 0x4ee   :  { %1325 = vsyncpa [#allocation8], 1 }

</bundles_post_ra>
